<compile_context>
chip_gen: v6e
topology: v6e:2x2x1
jax: 0.10.0
libtpu: 0.0.40
codegen_flags: <defaults>
</compile_context>

<pallas_src>
import jax
import jax.numpy as jnp
import numpy as np
from jax.experimental import pallas as pl
from jax.experimental.pallas import tpu as pltpu


def _softplus(x):
    # Overflow-safe softplus (exact for x <= 20, identity beyond; rho may be
    # learned to large positive values).
    return jnp.where(x > 20.0, x, jnp.log1p(jnp.exp(jnp.minimum(x, 20.0))))


def bayesian_nn_kernel(x_ref, w1s_ref, b1s_ref, w23s_ref, b23s_ref,
                       w1e_ref, b1e_ref, w23e_ref, b23e_ref,
                       out_ref, kl_ref):
    """One grid step == one Monte-Carlo sample.

    Static slabs (packed once, block index fixed -> VMEM-resident over the grid):
      w1s_ref  : (2, in, hid)       planes = (mu.T, rho.T) of bayes1 weight
      b1s_ref  : (2, 1, hid)        planes = (mu, rho) of bayes1 bias
      w23s_ref : (2, out, hid+in)   planes = (mu, rho) of [W2 | W3], native
                                    (out_features, in_features) orientation
      b23s_ref : (2, 2, out)        planes = (mu, rho); rows = (b2, b3)
    Per-sample eps slabs (leading S axis sliced by the grid):
      w1e_ref: (in, hid)  b1e_ref: (1, hid)  w23e_ref: (out, hid+in)  b23e_ref: (2, out)
    """
    hid = w1s_ref.shape[2]
    x = x_ref[...]

    def sample(static_ref, eps_ref):
        mu = static_ref[0]
        rho = static_ref[1]
        sig = _softplus(rho)
        sampled = mu + sig * eps_ref[...]
        kl_map = -jnp.log(sig) + 0.5 * (sig * sig + mu * mu) - 0.5
        return sampled, kl_map

    w1, klm_w1 = sample(w1s_ref, w1e_ref)        # (in, hid)
    b1, klm_b1 = sample(b1s_ref, b1e_ref)        # (1, hid)
    w23, klm_w23 = sample(w23s_ref, w23e_ref)    # (out, hid+in)  -- lane-dense
    b23, klm_b23 = sample(b23s_ref, b23e_ref)    # (2, out), rows = (b2, b3)

    # bayes1: h = leaky_relu(x @ W1.T + b1, 0.1)   (W1 pre-transposed once)
    h = jnp.dot(x, w1, preferred_element_type=jnp.float32) + b1
    h = jnp.where(h > 0.0, h, 0.1 * h)

    # bayes_out + bayes_skip: two accumulating MXU dots on static slices of the
    # sampled W23 (no lane-offset concatenate of [h, x]); the .T folds into the
    # dot lowering (same pattern as the reference paged-attention kernel).
    w2 = w23[:, :hid]                            # (out, hid)
    w3 = w23[:, hid:]                            # (out, in)
    out = jnp.dot(h, w2.T, preferred_element_type=jnp.float32)
    out = out + jnp.dot(x, w3.T, preferred_element_type=jnp.float32)
    out = out + jnp.sum(b23, axis=0, keepdims=True)     # + (b2 + b3)
    out_ref[...] = out.astype(out_ref.dtype)

    # KL: fold b1's row into W1's sublane-reduced row (same lane width) so the
    # epilogue does 3 final reductions instead of 4.
    kl = (jnp.sum(jnp.sum(klm_w1, axis=0, keepdims=True) + klm_b1)
          + jnp.sum(klm_w23) + jnp.sum(klm_b23))
    kl_ref[...] = kl.reshape(1, 1)


def init_bayes_linear(in_features, out_features):
    # Matches PyTorch __init__: mu = 0, rho = -4.0 (deterministic).
    return dict(
        weight_mu=jnp.zeros((out_features, in_features), jnp.float32),
        weight_rho=jnp.full((out_features, in_features), -4.0, jnp.float32),
        bias_mu=jnp.zeros((out_features,), jnp.float32),
        bias_rho=jnp.full((out_features,), -4.0, jnp.float32),
    )


def pack_static_slabs(params):
    """Pack (mu, rho) ONCE; reused across every forward / every MC sample."""
    p1, p2, p3 = params["l1"], params["l2"], params["l3"]
    w1s = jnp.stack([p1["weight_mu"].T, p1["weight_rho"].T])               # (2, in, hid)
    b1s = jnp.stack([p1["bias_mu"], p1["bias_rho"]])[:, None, :]           # (2, 1, hid)
    w23s = jnp.stack([
        jnp.concatenate([p2["weight_mu"], p3["weight_mu"]], axis=1),
        jnp.concatenate([p2["weight_rho"], p3["weight_rho"]], axis=1),
    ])                                                                     # (2, out, hid+in)
    b23s = jnp.stack([
        jnp.stack([p2["bias_mu"], p3["bias_mu"]]),
        jnp.stack([p2["bias_rho"], p3["bias_rho"]]),
    ])                                                                     # (2, 2, out)
    return w1s, b1s, w23s, b23s


def sample_eps_slabs(key, num_samples, input_dim, hidden_dim, output_dim):
    """Draw eps directly in the kernel's packed layouts -> zero per-call packing."""
    k1, k2, k3, k4 = jax.random.split(key, 4)
    return (
        jax.random.normal(k1, (num_samples, input_dim, hidden_dim), jnp.float32),
        jax.random.normal(k2, (num_samples, 1, hidden_dim), jnp.float32),
        jax.random.normal(k3, (num_samples, output_dim, hidden_dim + input_dim), jnp.float32),
        jax.random.normal(k4, (num_samples, 2, output_dim), jnp.float32),
    )


def bayesian_nn_forward(x, static_slabs, eps_slabs):
    """Returns (out: (S, B, out_dim), kl: (S,)) — one BayesianNN.forward per sample."""
    w1s, b1s, w23s, b23s = static_slabs
    w1e, b1e, w23e, b23e = eps_slabs
    S = w1e.shape[0]
    B, in_dim = x.shape
    hid = w1s.shape[2]
    out_dim = w23s.shape[1]

    fixed3 = lambda s: (0, 0, 0)
    per_s = lambda s: (s, 0, 0)

    out, kl = pl.pallas_call(
        bayesian_nn_kernel,
        out_shape=(
            jax.ShapeDtypeStruct((S, B, out_dim), jnp.float32),
            jax.ShapeDtypeStruct((S, 1, 1), jnp.float32),
        ),
        grid=(S,),
        in_specs=[
            pl.BlockSpec((B, in_dim), lambda s: (0, 0)),            # x: resident
            pl.BlockSpec((2, in_dim, hid), fixed3),                 # static slabs:
            pl.BlockSpec((2, 1, hid), fixed3),                      # DMA'd once, reused
            pl.BlockSpec((2, out_dim, hid + in_dim), fixed3),
            pl.BlockSpec((2, 2, out_dim), fixed3),
            pl.BlockSpec((None, in_dim, hid), per_s),               # per-sample eps
            pl.BlockSpec((None, 1, hid), per_s),
            pl.BlockSpec((None, out_dim, hid + in_dim), per_s),
            pl.BlockSpec((None, 2, out_dim), per_s),
        ],
        out_specs=(
            pl.BlockSpec((None, B, out_dim), per_s),
            pl.BlockSpec((None, 1, 1), per_s),
        ),
        compiler_params=pltpu.CompilerParams(
            dimension_semantics=("parallel",),   # shards samples across TCs on v7x
            vmem_limit_bytes=32 << 20,           # safe on v5e/v6e/v7x (64 MiB VMEM)
        ),
    )(x, w1s, b1s, w23s, b23s, w1e, b1e, w23e, b23e)
    return out, kl[:, 0, 0]


def reference_forward(x, params, eps_slabs):
    """Pure-JAX per-sample reference mirroring the PyTorch module."""
    w1e, b1e, w23e, b23e = eps_slabs
    hid = params["l1"]["weight_mu"].shape[0]
    S = w1e.shape[0]

    def layer(xi, p, ew, eb):
        wsig = jnp.log1p(jnp.exp(p["weight_rho"]))
        bsig = jnp.log1p(jnp.exp(p["bias_rho"]))
        w = p["weight_mu"] + wsig * ew
        b = p["bias_mu"] + bsig * eb
        out = xi @ w.T + b
        kl = (jnp.sum(-jnp.log(wsig) + 0.5 * (wsig ** 2 + p["weight_mu"] ** 2) - 0.5)
              + jnp.sum(-jnp.log(bsig) + 0.5 * (bsig ** 2 + p["bias_mu"] ** 2) - 0.5))
        return out, kl

    outs, kls = [], []
    for s in range(S):
        h, kl1 = layer(x, params["l1"], w1e[s].T, b1e[s, 0])
        h = jnp.where(h > 0, h, 0.1 * h)
        out_main, kl2 = layer(h, params["l2"], w23e[s, :, :hid], b23e[s, 0])
        out_skip, kl3 = layer(x, params["l3"], w23e[s, :, hid:], b23e[s, 1])
        outs.append(out_main + out_skip)
        kls.append(kl1 + kl2 + kl3)
    return jnp.stack(outs), jnp.stack(kls)


if __name__ == "__main__":
    batch, input_dim, hidden_dim, output_dim = 8, 16, 32, 8
    num_samples = 4   # Monte-Carlo samples handled by one pallas_call grid

    key = jax.random.PRNGKey(0)
    kx, keps = jax.random.split(key)
    x = jax.random.normal(kx, (batch, input_dim), jnp.float32)

    params = {
        "l1": init_bayes_linear(input_dim, hidden_dim),
        "l2": init_bayes_linear(hidden_dim, output_dim),
        "l3": init_bayes_linear(input_dim, output_dim),
    }
    static_slabs = pack_static_slabs(params)          # packed ONCE, reused
    eps_slabs = sample_eps_slabs(keps, num_samples, input_dim, hidden_dim, output_dim)

    out, total_kl = bayesian_nn_forward(x, static_slabs, eps_slabs)
    out = jax.block_until_ready(out)
    total_kl = jax.block_until_ready(total_kl)

    ref_out, ref_kl = reference_forward(x, params, eps_slabs)
    np.testing.assert_allclose(np.asarray(out), np.asarray(ref_out), rtol=1e-5, atol=1e-5)
    np.testing.assert_allclose(np.asarray(total_kl), np.asarray(ref_kl), rtol=1e-5, atol=1e-5)

    print("KERNEL_OK")
</pallas_src>

<mosaic_0001>
module attributes {stable_mosaic.version = 11 : i64} {
  func.func @bayesian_nn_kernel(%arg0: i32, %arg1: memref<8x16xf32, #tpu.memory_space<vmem>>, %arg2: memref<2x16x32xf32, #tpu.memory_space<vmem>>, %arg3: memref<2x1x32xf32, #tpu.memory_space<vmem>>, %arg4: memref<2x8x48xf32, #tpu.memory_space<vmem>>, %arg5: memref<2x2x8xf32, #tpu.memory_space<vmem>>, %arg6: memref<1x16x32xf32, #tpu.memory_space<vmem>>, %arg7: memref<1x1x32xf32, #tpu.memory_space<vmem>>, %arg8: memref<1x8x48xf32, #tpu.memory_space<vmem>>, %arg9: memref<1x2x8xf32, #tpu.memory_space<vmem>>, %arg10: memref<1x8x8xf32, #tpu.memory_space<vmem>>, %arg11: memref<1x1x1xf32, #tpu.memory_space<vmem>>) attributes {dimension_semantics = [#tpu.dimension_semantics<parallel>], iteration_bounds = array<i64: 4>, scalar_prefetch = 0 : i64, scratch_operands = 0 : i64, tpu.core_type = #tpu.core_type<tc>, window_params = [{pipeline_mode = #tpu.pipeline_mode<synchronous>, transform_indices = @transform_0, window_bounds = array<i64: 8, 16>}, {pipeline_mode = #tpu.pipeline_mode<synchronous>, transform_indices = @transform_1, window_bounds = array<i64: 2, 16, 32>}, {pipeline_mode = #tpu.pipeline_mode<synchronous>, transform_indices = @transform_2, window_bounds = array<i64: 2, 1, 32>}, {pipeline_mode = #tpu.pipeline_mode<synchronous>, transform_indices = @transform_3, window_bounds = array<i64: 2, 8, 48>}, {pipeline_mode = #tpu.pipeline_mode<synchronous>, transform_indices = @transform_4, window_bounds = array<i64: 2, 2, 8>}, {transform_indices = @transform_5, window_bounds = array<i64: 1, 16, 32>}, {transform_indices = @transform_6, window_bounds = array<i64: 1, 1, 32>}, {transform_indices = @transform_7, window_bounds = array<i64: 1, 8, 48>}, {transform_indices = @transform_8, window_bounds = array<i64: 1, 2, 8>}, {transform_indices = @transform_9, window_bounds = array<i64: 1, 8, 8>}, {transform_indices = @transform_10, window_bounds = array<i64: 1, 1, 1>}]} {
    %c0 = arith.constant 0 : index
    %c0_0 = arith.constant 0 : index
    %0 = vector.load %arg1[%c0, %c0_0] : memref<8x16xf32, #tpu.memory_space<vmem>>, vector<8x16xf32>
    %c0_1 = arith.constant 0 : index
    %c0_2 = arith.constant 0 : index
    %c0_3 = arith.constant 0 : index
    %1 = vector.load %arg2[%c0_1, %c0_2, %c0_3] : memref<2x16x32xf32, #tpu.memory_space<vmem>>, vector<1x16x32xf32>
    %2 = vector.shape_cast %1 : vector<1x16x32xf32> to vector<16x32xf32>
    %c1 = arith.constant 1 : index
    %c0_4 = arith.constant 0 : index
    %c0_5 = arith.constant 0 : index
    %3 = vector.load %arg2[%c1, %c0_4, %c0_5] : memref<2x16x32xf32, #tpu.memory_space<vmem>>, vector<1x16x32xf32>
    %4 = vector.shape_cast %3 : vector<1x16x32xf32> to vector<16x32xf32>
    %cst = arith.constant 2.000000e+01 : f32
    %5 = vector.broadcast %cst : f32 to vector<16x32xf32>
    %6 = arith.cmpf ogt, %4, %5 : vector<16x32xf32>
    %cst_6 = arith.constant 2.000000e+01 : f32
    %7 = vector.broadcast %cst_6 : f32 to vector<16x32xf32>
    %8 = arith.minimumf %4, %7 : vector<16x32xf32>
    %9 = math.exp %8 : vector<16x32xf32>
    %10 = math.log1p %9 : vector<16x32xf32>
    %11 = arith.select %6, %4, %10 : vector<16x32xi1>, vector<16x32xf32>
    %c0_7 = arith.constant 0 : index
    %c0_8 = arith.constant 0 : index
    %c0_9 = arith.constant 0 : index
    %12 = vector.load %arg6[%c0_7, %c0_8, %c0_9] : memref<1x16x32xf32, #tpu.memory_space<vmem>>, vector<1x16x32xf32>
    %13 = vector.shape_cast %12 : vector<1x16x32xf32> to vector<16x32xf32>
    %14 = arith.mulf %11, %13 : vector<16x32xf32>
    %15 = arith.addf %2, %14 : vector<16x32xf32>
    %16 = math.log %11 : vector<16x32xf32>
    %cst_10 = arith.constant 0.000000e+00 : f32
    %17 = vector.broadcast %cst_10 : f32 to vector<16x32xf32>
    %18 = arith.subf %17, %16 : vector<16x32xf32>
    %19 = arith.mulf %11, %11 : vector<16x32xf32>
    %20 = arith.mulf %2, %2 : vector<16x32xf32>
    %21 = arith.addf %19, %20 : vector<16x32xf32>
    %cst_11 = arith.constant 5.000000e-01 : f32
    %22 = vector.broadcast %cst_11 : f32 to vector<16x32xf32>
    %23 = arith.mulf %22, %21 : vector<16x32xf32>
    %24 = arith.addf %18, %23 : vector<16x32xf32>
    %cst_12 = arith.constant 5.000000e-01 : f32
    %25 = vector.broadcast %cst_12 : f32 to vector<16x32xf32>
    %26 = arith.subf %24, %25 : vector<16x32xf32>
    %c0_13 = arith.constant 0 : index
    %c0_14 = arith.constant 0 : index
    %c0_15 = arith.constant 0 : index
    %27 = vector.load %arg3[%c0_13, %c0_14, %c0_15] : memref<2x1x32xf32, #tpu.memory_space<vmem>>, vector<1x1x32xf32>
    %28 = vector.shape_cast %27 : vector<1x1x32xf32> to vector<1x32xf32>
    %c1_16 = arith.constant 1 : index
    %c0_17 = arith.constant 0 : index
    %c0_18 = arith.constant 0 : index
    %29 = vector.load %arg3[%c1_16, %c0_17, %c0_18] : memref<2x1x32xf32, #tpu.memory_space<vmem>>, vector<1x1x32xf32>
    %30 = vector.shape_cast %29 : vector<1x1x32xf32> to vector<1x32xf32>
    %cst_19 = arith.constant 2.000000e+01 : f32
    %31 = vector.broadcast %cst_19 : f32 to vector<1x32xf32>
    %32 = arith.cmpf ogt, %30, %31 : vector<1x32xf32>
    %cst_20 = arith.constant 2.000000e+01 : f32
    %33 = vector.broadcast %cst_20 : f32 to vector<1x32xf32>
    %34 = arith.minimumf %30, %33 : vector<1x32xf32>
    %35 = math.exp %34 : vector<1x32xf32>
    %36 = math.log1p %35 : vector<1x32xf32>
    %37 = arith.select %32, %30, %36 : vector<1x32xi1>, vector<1x32xf32>
    %c0_21 = arith.constant 0 : index
    %c0_22 = arith.constant 0 : index
    %c0_23 = arith.constant 0 : index
    %38 = vector.load %arg7[%c0_21, %c0_22, %c0_23] : memref<1x1x32xf32, #tpu.memory_space<vmem>>, vector<1x1x32xf32>
    %39 = vector.shape_cast %38 : vector<1x1x32xf32> to vector<1x32xf32>
    %40 = arith.mulf %37, %39 : vector<1x32xf32>
    %41 = arith.addf %28, %40 : vector<1x32xf32>
    %42 = math.log %37 : vector<1x32xf32>
    %cst_24 = arith.constant 0.000000e+00 : f32
    %43 = vector.broadcast %cst_24 : f32 to vector<1x32xf32>
    %44 = arith.subf %43, %42 : vector<1x32xf32>
    %45 = arith.mulf %37, %37 : vector<1x32xf32>
    %46 = arith.mulf %28, %28 : vector<1x32xf32>
    %47 = arith.addf %45, %46 : vector<1x32xf32>
    %cst_25 = arith.constant 5.000000e-01 : f32
    %48 = vector.broadcast %cst_25 : f32 to vector<1x32xf32>
    %49 = arith.mulf %48, %47 : vector<1x32xf32>
    %50 = arith.addf %44, %49 : vector<1x32xf32>
    %cst_26 = arith.constant 5.000000e-01 : f32
    %51 = vector.broadcast %cst_26 : f32 to vector<1x32xf32>
    %52 = arith.subf %50, %51 : vector<1x32xf32>
    %c0_27 = arith.constant 0 : index
    %c0_28 = arith.constant 0 : index
    %c0_29 = arith.constant 0 : index
    %53 = vector.load %arg4[%c0_27, %c0_28, %c0_29] : memref<2x8x48xf32, #tpu.memory_space<vmem>>, vector<1x8x48xf32>
    %54 = vector.shape_cast %53 : vector<1x8x48xf32> to vector<8x48xf32>
    %c1_30 = arith.constant 1 : index
    %c0_31 = arith.constant 0 : index
    %c0_32 = arith.constant 0 : index
    %55 = vector.load %arg4[%c1_30, %c0_31, %c0_32] : memref<2x8x48xf32, #tpu.memory_space<vmem>>, vector<1x8x48xf32>
    %56 = vector.shape_cast %55 : vector<1x8x48xf32> to vector<8x48xf32>
    %cst_33 = arith.constant 2.000000e+01 : f32
    %57 = vector.broadcast %cst_33 : f32 to vector<8x48xf32>
    %58 = arith.cmpf ogt, %56, %57 : vector<8x48xf32>
    %cst_34 = arith.constant 2.000000e+01 : f32
    %59 = vector.broadcast %cst_34 : f32 to vector<8x48xf32>
    %60 = arith.minimumf %56, %59 : vector<8x48xf32>
    %61 = math.exp %60 : vector<8x48xf32>
    %62 = math.log1p %61 : vector<8x48xf32>
    %63 = arith.select %58, %56, %62 : vector<8x48xi1>, vector<8x48xf32>
    %c0_35 = arith.constant 0 : index
    %c0_36 = arith.constant 0 : index
    %c0_37 = arith.constant 0 : index
    %64 = vector.load %arg8[%c0_35, %c0_36, %c0_37] : memref<1x8x48xf32, #tpu.memory_space<vmem>>, vector<1x8x48xf32>
    %65 = vector.shape_cast %64 : vector<1x8x48xf32> to vector<8x48xf32>
    %66 = arith.mulf %63, %65 : vector<8x48xf32>
    %67 = arith.addf %54, %66 : vector<8x48xf32>
    %68 = math.log %63 : vector<8x48xf32>
    %cst_38 = arith.constant 0.000000e+00 : f32
    %69 = vector.broadcast %cst_38 : f32 to vector<8x48xf32>
    %70 = arith.subf %69, %68 : vector<8x48xf32>
    %71 = arith.mulf %63, %63 : vector<8x48xf32>
    %72 = arith.mulf %54, %54 : vector<8x48xf32>
    %73 = arith.addf %71, %72 : vector<8x48xf32>
    %cst_39 = arith.constant 5.000000e-01 : f32
    %74 = vector.broadcast %cst_39 : f32 to vector<8x48xf32>
    %75 = arith.mulf %74, %73 : vector<8x48xf32>
    %76 = arith.addf %70, %75 : vector<8x48xf32>
    %cst_40 = arith.constant 5.000000e-01 : f32
    %77 = vector.broadcast %cst_40 : f32 to vector<8x48xf32>
    %78 = arith.subf %76, %77 : vector<8x48xf32>
    %c0_41 = arith.constant 0 : index
    %c0_42 = arith.constant 0 : index
    %c0_43 = arith.constant 0 : index
    %79 = vector.load %arg5[%c0_41, %c0_42, %c0_43] : memref<2x2x8xf32, #tpu.memory_space<vmem>>, vector<1x2x8xf32>
    %80 = vector.shape_cast %79 : vector<1x2x8xf32> to vector<2x8xf32>
    %c1_44 = arith.constant 1 : index
    %c0_45 = arith.constant 0 : index
    %c0_46 = arith.constant 0 : index
    %81 = vector.load %arg5[%c1_44, %c0_45, %c0_46] : memref<2x2x8xf32, #tpu.memory_space<vmem>>, vector<1x2x8xf32>
    %82 = vector.shape_cast %81 : vector<1x2x8xf32> to vector<2x8xf32>
    %cst_47 = arith.constant 2.000000e+01 : f32
    %83 = vector.broadcast %cst_47 : f32 to vector<2x8xf32>
    %84 = arith.cmpf ogt, %82, %83 : vector<2x8xf32>
    %cst_48 = arith.constant 2.000000e+01 : f32
    %85 = vector.broadcast %cst_48 : f32 to vector<2x8xf32>
    %86 = arith.minimumf %82, %85 : vector<2x8xf32>
    %87 = math.exp %86 : vector<2x8xf32>
    %88 = math.log1p %87 : vector<2x8xf32>
    %89 = arith.select %84, %82, %88 : vector<2x8xi1>, vector<2x8xf32>
    %c0_49 = arith.constant 0 : index
    %c0_50 = arith.constant 0 : index
    %c0_51 = arith.constant 0 : index
    %90 = vector.load %arg9[%c0_49, %c0_50, %c0_51] : memref<1x2x8xf32, #tpu.memory_space<vmem>>, vector<1x2x8xf32>
    %91 = vector.shape_cast %90 : vector<1x2x8xf32> to vector<2x8xf32>
    %92 = arith.mulf %89, %91 : vector<2x8xf32>
    %93 = arith.addf %80, %92 : vector<2x8xf32>
    %94 = math.log %89 : vector<2x8xf32>
    %cst_52 = arith.constant 0.000000e+00 : f32
    %95 = vector.broadcast %cst_52 : f32 to vector<2x8xf32>
    %96 = arith.subf %95, %94 : vector<2x8xf32>
    %97 = arith.mulf %89, %89 : vector<2x8xf32>
    %98 = arith.mulf %80, %80 : vector<2x8xf32>
    %99 = arith.addf %97, %98 : vector<2x8xf32>
    %cst_53 = arith.constant 5.000000e-01 : f32
    %100 = vector.broadcast %cst_53 : f32 to vector<2x8xf32>
    %101 = arith.mulf %100, %99 : vector<2x8xf32>
    %102 = arith.addf %96, %101 : vector<2x8xf32>
    %cst_54 = arith.constant 5.000000e-01 : f32
    %103 = vector.broadcast %cst_54 : f32 to vector<2x8xf32>
    %104 = arith.subf %102, %103 : vector<2x8xf32>
    %cst_55 = arith.constant dense<0.000000e+00> : vector<8x32xf32>
    %105 = tpu.matmul %0, %15, %cst_55 {dimension_numbers = #tpu.dot_dimension_numbers<[1], [0], [0], [1], [0, 0, 1, 1], [], []>} : vector<8x16xf32>, vector<16x32xf32>, vector<8x32xf32> -> vector<8x32xf32>
    %106 = vector.broadcast %41 : vector<1x32xf32> to vector<8x32xf32>
    %107 = arith.addf %105, %106 : vector<8x32xf32>
    %cst_56 = arith.constant 0.000000e+00 : f32
    %108 = vector.broadcast %cst_56 : f32 to vector<8x32xf32>
    %109 = arith.cmpf ogt, %107, %108 : vector<8x32xf32>
    %cst_57 = arith.constant 1.000000e-01 : f32
    %110 = vector.broadcast %cst_57 : f32 to vector<8x32xf32>
    %111 = arith.mulf %110, %107 : vector<8x32xf32>
    %112 = arith.select %109, %107, %111 : vector<8x32xi1>, vector<8x32xf32>
    %113 = vector.extract_strided_slice %67 {offsets = [0, 0], sizes = [8, 32], strides = [1, 1]} : vector<8x48xf32> to vector<8x32xf32>
    %114 = vector.extract_strided_slice %67 {offsets = [0, 32], sizes = [8, 16], strides = [1, 1]} : vector<8x48xf32> to vector<8x16xf32>
    %115 = tpu.transpose %113, [1, 0] : vector<8x32xf32> -> vector<32x8xf32>
    %cst_58 = arith.constant dense<0.000000e+00> : vector<8x8xf32>
    %116 = tpu.matmul %112, %115, %cst_58 {dimension_numbers = #tpu.dot_dimension_numbers<[1], [0], [0], [1], [0, 0, 1, 1], [], []>} : vector<8x32xf32>, vector<32x8xf32>, vector<8x8xf32> -> vector<8x8xf32>
    %117 = tpu.transpose %114, [1, 0] : vector<8x16xf32> -> vector<16x8xf32>
    %cst_59 = arith.constant dense<0.000000e+00> : vector<8x8xf32>
    %118 = tpu.matmul %0, %117, %cst_59 {dimension_numbers = #tpu.dot_dimension_numbers<[1], [0], [0], [1], [0, 0, 1, 1], [], []>} : vector<8x16xf32>, vector<16x8xf32>, vector<8x8xf32> -> vector<8x8xf32>
    %119 = arith.addf %116, %118 : vector<8x8xf32>
    %cst_60 = arith.constant dense<0.000000e+00> : vector<8xf32>
    %120 = vector.multi_reduction <add>, %93, %cst_60 [0] : vector<2x8xf32> to vector<8xf32>
    %121 = vector.shape_cast %120 : vector<8xf32> to vector<1x8xf32>
    %122 = vector.broadcast %121 : vector<1x8xf32> to vector<8x8xf32>
    %123 = arith.addf %119, %122 : vector<8x8xf32>
    %c0_61 = arith.constant 0 : index
    %c0_62 = arith.constant 0 : index
    %c0_63 = arith.constant 0 : index
    %124 = vector.load %arg10[%c0_61, %c0_62, %c0_63] : memref<1x8x8xf32, #tpu.memory_space<vmem>>, vector<1x8x8xf32>
    %125 = vector.shape_cast %124 : vector<1x8x8xf32> to vector<8x8xf32>
    %126 = vector.shape_cast %123 : vector<8x8xf32> to vector<1x8x8xf32>
    tpu.vector_store %arg10[%c0_61, %c0_62, %c0_63], %126 {strides = array<i32>} : memref<1x8x8xf32, #tpu.memory_space<vmem>>, vector<1x8x8xf32>,
    %cst_64 = arith.constant dense<0.000000e+00> : vector<32xf32>
    %127 = vector.multi_reduction <add>, %26, %cst_64 [0] : vector<16x32xf32> to vector<32xf32>
    %128 = vector.shape_cast %127 : vector<32xf32> to vector<1x32xf32>
    %129 = arith.addf %128, %52 : vector<1x32xf32>
    %130 = vector.shape_cast %129 : vector<1x32xf32> to vector<1x1x32xf32>
    %cst_65 = arith.constant dense<0.000000e+00> : vector<1xf32>
    %131 = vector.multi_reduction <add>, %130, %cst_65 [1, 2] : vector<1x1x32xf32> to vector<1xf32>
    %132 = vector.shape_cast %131 : vector<1xf32> to vector<1x1x1xf32>
    %133 = vector.extract %132[0, 0, 0] : f32 from vector<1x1x1xf32>
    %134 = vector.shape_cast %78 : vector<8x48xf32> to vector<1x8x48xf32>
    %cst_66 = arith.constant dense<0.000000e+00> : vector<1xf32>
    %135 = vector.multi_reduction <add>, %134, %cst_66 [1, 2] : vector<1x8x48xf32> to vector<1xf32>
    %136 = vector.shape_cast %135 : vector<1xf32> to vector<1x1x1xf32>
    %137 = vector.extract %136[0, 0, 0] : f32 from vector<1x1x1xf32>
    %138 = arith.addf %133, %137 : f32
    %139 = vector.shape_cast %104 : vector<2x8xf32> to vector<1x2x8xf32>
    %cst_67 = arith.constant dense<0.000000e+00> : vector<1xf32>
    %140 = vector.multi_reduction <add>, %139, %cst_67 [1, 2] : vector<1x2x8xf32> to vector<1xf32>
    %141 = vector.shape_cast %140 : vector<1xf32> to vector<1x1x1xf32>
    %142 = vector.extract %141[0, 0, 0] : f32 from vector<1x1x1xf32>
    %143 = arith.addf %138, %142 : f32
    %144 = vector.broadcast %143 : f32 to vector<1x1xf32>
    %c0_68 = arith.constant 0 : index
    %c0_69 = arith.constant 0 : index
    %c0_70 = arith.constant 0 : index
    %145 = vector.load %arg11[%c0_68, %c0_69, %c0_70] : memref<1x1x1xf32, #tpu.memory_space<vmem>>, vector<1x1x1xf32>
    %146 = vector.shape_cast %145 : vector<1x1x1xf32> to vector<1x1xf32>
    %147 = vector.shape_cast %144 : vector<1x1xf32> to vector<1x1x1xf32>
    tpu.vector_store %arg11[%c0_68, %c0_69, %c0_70], %147 {strides = array<i32>} : memref<1x1x1xf32, #tpu.memory_space<vmem>>, vector<1x1x1xf32>,
    return
  }
  func.func @transform_0(%arg0: i32) -> (i32, i32) {
    %c0_i32 = arith.constant 0 : i32
    %c0_i32_0 = arith.constant 0 : i32
    %c0_i32_1 = arith.constant 0 : i32
    return %c0_i32, %c0_i32_0 : i32, i32
  }
  func.func @transform_1(%arg0: i32) -> (i32, i32, i32) {
    %c0_i32 = arith.constant 0 : i32
    %c0_i32_0 = arith.constant 0 : i32
    %c0_i32_1 = arith.constant 0 : i32
    %c0_i32_2 = arith.constant 0 : i32
    return %c0_i32, %c0_i32_0, %c0_i32_1 : i32, i32, i32
  }
  func.func @transform_2(%arg0: i32) -> (i32, i32, i32) {
    %c0_i32 = arith.constant 0 : i32
    %c0_i32_0 = arith.constant 0 : i32
    %c0_i32_1 = arith.constant 0 : i32
    %c0_i32_2 = arith.constant 0 : i32
    return %c0_i32, %c0_i32_0, %c0_i32_1 : i32, i32, i32
  }
  func.func @transform_3(%arg0: i32) -> (i32, i32, i32) {
    %c0_i32 = arith.constant 0 : i32
    %c0_i32_0 = arith.constant 0 : i32
    %c0_i32_1 = arith.constant 0 : i32
    %c0_i32_2 = arith.constant 0 : i32
    return %c0_i32, %c0_i32_0, %c0_i32_1 : i32, i32, i32
  }
  func.func @transform_4(%arg0: i32) -> (i32, i32, i32) {
    %c0_i32 = arith.constant 0 : i32
    %c0_i32_0 = arith.constant 0 : i32
    %c0_i32_1 = arith.constant 0 : i32
    %c0_i32_2 = arith.constant 0 : i32
    return %c0_i32, %c0_i32_0, %c0_i32_1 : i32, i32, i32
  }
  func.func @transform_5(%arg0: i32) -> (i32, i32, i32) {
    %c0_i32 = arith.constant 0 : i32
    %c0_i32_0 = arith.constant 0 : i32
    %c0_i32_1 = arith.constant 0 : i32
    return %arg0, %c0_i32, %c0_i32_0 : i32, i32, i32
  }
  func.func @transform_6(%arg0: i32) -> (i32, i32, i32) {
    %c0_i32 = arith.constant 0 : i32
    %c0_i32_0 = arith.constant 0 : i32
    %c0_i32_1 = arith.constant 0 : i32
    return %arg0, %c0_i32, %c0_i32_0 : i32, i32, i32
  }
  func.func @transform_7(%arg0: i32) -> (i32, i32, i32) {
    %c0_i32 = arith.constant 0 : i32
    %c0_i32_0 = arith.constant 0 : i32
    %c0_i32_1 = arith.constant 0 : i32
    return %arg0, %c0_i32, %c0_i32_0 : i32, i32, i32
  }
  func.func @transform_8(%arg0: i32) -> (i32, i32, i32) {
    %c0_i32 = arith.constant 0 : i32
    %c0_i32_0 = arith.constant 0 : i32
    %c0_i32_1 = arith.constant 0 : i32
    return %arg0, %c0_i32, %c0_i32_0 : i32, i32, i32
  }
  func.func @transform_9(%arg0: i32) -> (i32, i32, i32) {
    %c0_i32 = arith.constant 0 : i32
    %c0_i32_0 = arith.constant 0 : i32
    %c0_i32_1 = arith.constant 0 : i32
    return %arg0, %c0_i32, %c0_i32_0 : i32, i32, i32
  }
  func.func @transform_10(%arg0: i32) -> (i32, i32, i32) {
    %c0_i32 = arith.constant 0 : i32
    %c0_i32_0 = arith.constant 0 : i32
    %c0_i32_1 = arith.constant 0 : i32
    return %arg0, %c0_i32, %c0_i32_0 : i32, i32, i32
  }
}

</mosaic_0001>

<bundles_post_ra>
// kernel: tpu_custom_call.1
= control target key start
LH: loop header
LB: loop body
LE: loop exit
PB: predicated region body
PF: predicated region fallthrough
CT: control target
= control target key end

     0   :  { %s2037_s0 = inlined_call_operand.hbm [shape: f32[8,16], index: 0, kind: input, shape index: {}]   ;;  %s2038_s1 = inlined_call_operand.hbm [shape: f32[2,16,32], index: 1, kind: input, shape index: {}]   ;;  %s2039_s2 = inlined_call_operand.vmem [shape: f32[2,1,32], index: 2, kind: input, shape index: {}]   ;;  %s2040_s3 = inlined_call_operand.hbm [shape: f32[2,8,48], index: 3, kind: input, shape index: {}]   ;;  %s2041_s4 = inlined_call_operand.vmem [shape: f32[2,2,8], index: 4, kind: input, shape index: {}]   ;;  %s2042_s5 = inlined_call_operand.hbm [shape: f32[4,16,32], index: 5, kind: input, shape index: {}]   ;;  %s2043_s6 = inlined_call_operand.hbm [shape: f32[4,1,32], index: 6, kind: input, shape index: {}]   ;;  %s2044_s7 = inlined_call_operand.hbm [shape: f32[4,8,48], index: 7, kind: input, shape index: {}]   ;;  %s2045_s8 = inlined_call_operand.vmem [shape: f32[4,2,8], index: 8, kind: input, shape index: {}]   ;;  %s2046_s9 = inlined_call_operand.hbm [shape: f32[4,8,8], index: 9, kind: output, shape index: {0}]   ;;  %s2047_s10 = inlined_call_operand.vmem [shape: f32[4,1,1], index: 10, kind: output, shape index: {1}]  }
   0x1   :  { %2069 = sst [smem:[#allocation25_spill]] %s2037_s0 }
   0x2   :  { %2070 = sst [smem:[#allocation26_spill]] %s2038_s1 }
   0x3   :  { %2071 = sst [smem:[#allocation27_spill]] %s2042_s5 }
   0x4   :  { %2072 = sst [smem:[#allocation28_spill]] %s2046_s9 }
   0x5   :  { %16 = vsyncpa [#allocation3], 0 }
   0x6   :  { %17 = vsyncpa [#allocation6], 0 }
   0x7   :  { %18 = vsyncpa [#allocation9], 0 }
   0x8   :  { %20 = vsyncpa [#allocation9 + $0x1], 0 }
   0x9   :  { %21 = vsyncpa [#allocation12], 0 }
   0xa   :  { %23 = vsyncpa [#allocation12 + $0x1], 0 }
   0xb   :  { %24 = vsyncpa [#allocation4], 0 }
   0xc   :  { %26 = vsyncpa [#allocation4 + $0x1], 0  ;;  %s1639_s13 = smov 0   ;;  %s1641_s14 = smov 0  }
   0xd   :  { %s1643_s15 = smov 0   ;;  %s1645_s16 = smov 0  }
   0xe LB: > { %2073 = sst [smem:[#allocation19_spill]] %s1558_s13  ;;  %s1660_s17 = sadd.s32 4294967295, %s1570_s16   ;;  %s1570_s16 = sphi %s1645_s16, %s2118_s16   ;;  %s1566_s15 = sphi %s1643_s15, %s2120_s15   ;;  %s1562_s14 = sphi %s1641_s14, %s2122_s14   ;;  %s1558_s13 = sphi %s1639_s13, %s2121_s13  }
   0xf   : > { %2074 = sst [smem:[#allocation20_spill]] %s1566_s15  ;;  %s1143_s18 = sadd.s32 4294967294, %s1570_s16  }
  0x10   : > { %s1664_s19 = sadd.s32 1, %s1570_s16   ;;  %s144_s20 = sadd.s32 1, %s1566_s15 }
  0x11   : > { %2075 = sst [smem:[#allocation21_spill]] %s1664_s19  ;;  %s141_s21 = ssub.s32 %s1570_s16, %s1664_s19 }
  0x12   : > { %p151_p0 = scmp.ne.s32.totalorder %s1566_s15, %s1562_s14  ;;  %p142_p1 = scmp.eq.s32.totalorder %s141_s21, 0 }
  0x13   : > { %p152_p2 = scmp.eq.s32.totalorder %s1570_s16, 0  ;;  %p157_p3 = scmp.ne.s32.totalorder %s1562_s14, %s1558_s13 }
  0x14   : > { %p2061_p4 = scmp.eq.s32.totalorder %s1660_s17, 0  ;;  %p259_p7 = scmp.eq.s32.totalorder %s1660_s17, 3 }
  0x15   : > { %s1676_s22 = scalar_select %p142_p1, %s1566_s15, %s144_s20  }
  0x16   : > { %p1678_p5 = por %p152_p2, %p151_p0  ;;  %p1684_p6 = por %p2061_p4, %p157_p3 }
  0x17   : > { %2076 = sst [smem:[#allocation22_spill]] %s1676_s22  ;;  %p265_p8 = scmp.eq.s32.totalorder %s1143_s18, 3 }
  0x18   : > { %s2078_s24 = scalar_select %p1684_p6, 1, 0 }
  0x19   : > { %p1144_p9 = scmp.ge.s32.totalorder %s1570_s16, 1  ;;  %p298_p10 = scmp.lt.s32.totalorder %s1570_s16, 5 }
  0x1a   : > { %p1691_p11 = por %p259_p7, %p151_p0  ;;  %p1695_p12 = por %p265_p8, %p157_p3 }
  0x1b   : > { %p1699_p13 = pnand %p1144_p9, %p298_p10  ;;  %s1572_s28 = smov [#allocation5]  }
  0x1c   : > { %s2079_s25 = scalar_select %p1691_p11, 1, 0 }
  0x1d   : > { %s2081_s26 = scalar_select %p1695_p12, 1, 0 }
  0x1e   : > { %2080 = sst [smem:[#allocation23_spill]] %s2079_s25  ;;  %p1230_p1 = pneg %p1699_p13 }
  0x1f   : > { %2082 = sst [smem:[#allocation24_spill]] %s2081_s26  ;;  %s321_s29 = sshll.u32 %s1572_s28, 4  ;;  %s322_s29 = int_to_ptr.vmem [resolvable:$true] %s321_s29 }
  0x20   : > { %s2083_s27 = scalar_select %p1699_p13, 1, 0 }
  0x21   : > { %p1707_p2 = pnand %p1230_p1, %p2061_p4  ;;  %p1257_p0 = scmp.lt.s32.totalorder %s1570_s16, 4 }
  0x22   : > { %s354_s11 = sand.u32 1, %s1570_s16   ;;  %s1343_s12 = scalar_lea.vmem %s322_s29, 512 }
  0x23   : > { %s2084_s30 = scalar_select %p1707_p2, 1, 0 }
  0x24   : > { %p2062_p3 = pneg %p1707_p2  ;;  %p1344_p7 = scmp.ne.s32.totalorder %s322_s29, %s1343_s12 }
  0x25   : > { %p1351_p10 = scmp.lt.s32.totalorder %s322_s29, %s322_s29  ;;  %p1352_p12 = scmp.lt.s32.totalorder %s1343_s12, %s1343_s12 }
  0x26   : > { %p1346_p8 = pnand %p1344_p7, %p2062_p3 }
  0x27   : > { %p1353_p11 = por %p1352_p12, %p1351_p10 }
  0x28   : > { %p1347_p9 = pneg %p1346_p8 }
  0x2a   : > { %p1354_p6 = pnand %p1353_p11, %p1347_p9 }
  0x2c   : > { %1357 = shalt.err (!%p1354_p6)
}
  0x2d   : > { %s2057_s18 = smov 128   ;;  %s2059_s20 = smov 8  }
  0x2e   : > { %s2085_s1 = sld [smem:[#allocation26_spill]]  ;;  %s1727_s22 = sand.u32 1, %s1566_s15  }
  0x2f   : > { %s1179_s12 = sshll.u32 %s1570_s16, 8  ;;  %s1149_s19 = sshll.u32 %s1727_s22, 4 }
  0x30   : > { %s2086_s5 = sld [smem:[#allocation27_spill]]  ;;  %p1740_p6 = pnand %p1257_p0, %p1678_p5 }
  0x31   : > { %s1746_s28 = scalar_lea.sflag [#allocation9], %s354_s11 }
  0x32   : > { %s2087_s25 = scalar_select %p1740_p6, 1, 0 }
  0x33   : > { %p1752_p12 = pneg %p1740_p6 }
  0x34   : > { %1236 = dma.hbm_to_vmem [thread:$0]  (!%p1707_p2), %s2085_s1, 512, %s322_s29, [#allocation6], %s2057_s18, %s2057_s18, %s2059_s20  }
  0x35   : > { %s358_s29 = scalar_lea.vmem [#allocation8], %s1149_s19 }
  0x36   : > { %s1734_s9 = scalar_lea.hbm %s2086_s5, %s1179_s12  ;;  %s365_s21 = sshll.u32 %s358_s29, 4  ;;  %s1744_s21 = int_to_ptr.vmem [resolvable:$true] %s365_s21 }
  0x37   : > { %s1358_s18 = scalar_lea.hbm %s1734_s9, 256  ;;  %s1363_s19 = scalar_lea.hbm %s2086_s5, 1024 }
  0x38   : > { %p1359_p11 = scmp.ne.s32.totalorder %s1734_s9, %s1358_s18  ;;  %p1364_p0 = scmp.lt.s32.totalorder %s1734_s9, %s2086_s5 }
  0x39   : > { %p1365_p7 = scmp.lt.s32.totalorder %s1363_s19, %s1358_s18 }
  0x3a   : > { %p1361_p5 = pnand %p1752_p12, %p1359_p11 }
  0x3b   : > { %p1366_p8 = por %p1365_p7, %p1364_p0 }
  0x3c   : > { %p1362_p1 = pneg %p1361_p5 }
  0x3e   : > { %p1367_p9 = pnand %p1366_p8, %p1362_p1 }
  0x40   : > { %1370 = shalt.err (!%p1367_p9)
}
  0x41   : > { %s1371_s11 = scalar_lea.vmem %s1744_s21, 256  ;;  %s1575_s20 = smov [#allocation8]  }
  0x42   : > { %p1372_p10 = scmp.ne.s32.totalorder %s1744_s21, %s1371_s11  ;;  %s1376_s23 = sshll.u32 %s1575_s20, 4  ;;  %s1377_s23 = int_to_ptr.vmem [resolvable:$false] %s1376_s23 }
  0x43   : > { %s1378_s26 = scalar_lea.vmem %s1377_s23, 512  ;;  %p1379_p4 = scmp.lt.s32.totalorder %s1744_s21, %s1377_s23 }
  0x44   : > { %p1374_p11 = pnand %p1372_p10, %p1752_p12  ;;  %p1380_p3 = scmp.lt.s32.totalorder %s1378_s26, %s1371_s11 }
  0x46   : > { %p1375_p5 = pneg %p1374_p11  ;;  %p1381_p13 = por %p1380_p3, %p1379_p4 }
  0x48   : > { %p1382_p2 = pnand %p1381_p13, %p1375_p5 }
  0x4a   : > { %1385 = shalt.err (!%p1382_p2)
}
  0x4b   : > { %s2089_s18 = smov 8   ;;  %s2090_s19 = smov 128  }
  0x4c   : > { %1243 = dma.hbm_to_vmem [thread:$0]  (!%p1740_p6), %s1734_s9, 256, %s1744_s21, %s1746_s28, %s2090_s19, %s2090_s19, %s2089_s18  }
  0x4d   : > { %s1576_s12 = smov [#allocation2]   ;;  %s1577_s20 = smov [#allocation7]  }
  0x4e   : > { %s311_s29 = sshll.u32 %s1576_s12, 4  ;;  %s337_s1 = sshll.u32 %s1577_s20, 4  ;;  %s312_s29 = int_to_ptr.vmem [resolvable:$true] %s311_s29  ;;  %s338_s1 = int_to_ptr.vmem [resolvable:$true] %s337_s1 }
  0x4f   : > { %s1397_s23 = scalar_lea.vmem %s312_s29, 128  ;;  %p2091_p4 = scmp.ne.s32.totalorder %s2084_s30, 0 }
  0x50   : > { %p1398_p1 = scmp.ne.s32.totalorder %s312_s29, %s1397_s23  ;;  %p1405_p0 = scmp.lt.s32.totalorder %s312_s29, %s312_s29 }
  0x51   : > { %p2092_p13 = pneg %p2091_p4  ;;  %p1406_p7 = scmp.lt.s32.totalorder %s1397_s23, %s1397_s23 }
  0x53   : > { %p1400_p2 = pnand %p1398_p1, %p2092_p13  ;;  %p1407_p8 = por %p1406_p7, %p1405_p0 }
  0x55   : > { %p1401_p3 = pneg %p1400_p2 }
  0x57   : > { %p1408_p9 = pnand %p1407_p8, %p1401_p3 }
  0x59   : > { %1411 = shalt.err (!%p1408_p9)
}
  0x5a   : > { %s2093_s0 = sld [smem:[#allocation25_spill]]  ;;  %s1423_s21 = scalar_lea.vmem %s338_s1, 256 }
  0x5b   : > { %p1424_p10 = scmp.ne.s32.totalorder %s338_s1, %s1423_s21  ;;  %p2094_p11 = pmov %p2092_p13 }
  0x5c   : > { %p1431_p13 = scmp.lt.s32.totalorder %s338_s1, %s338_s1  ;;  %p1432_p2 = scmp.lt.s32.totalorder %s1423_s21, %s1423_s21 }
  0x5d   : > { %p1426_p5 = pnand %p1424_p10, %p2094_p11 }
  0x5e   : > { %p1433_p6 = por %p1432_p2, %p1431_p13 }
  0x5f   : > { %p1427_p1 = pneg %p1426_p5 }
  0x60   : > { %1233 = dma.hbm_to_vmem [thread:$0]  (!%p2091_p4), %s2093_s0, 128, %s312_s29, [#allocation3]  }
  0x61   : > { %p1434_p0 = pnand %p1433_p6, %p1427_p1 }
  0x63   : > { %1437 = shalt.err (!%p1434_p0)
}
  0x64   : > { %1239 = dma.hbm_to_vmem [thread:$0]  (!%p2091_p4), %s2040_s3, 256, %s338_s1, [#allocation6], %s2090_s19, %s2090_s19, %s2089_s18  }
  0x65   : > { %s1152_s29 = sshll.u32 %s1570_s16, 4  ;;  %s378_s20 = scalar_lea.vmem [#allocation10], %s1727_s22 }
  0x66   : > { %s385_s23 = sshll.u32 %s378_s20, 4  ;;  %s383_s21 = scalar_lea.hbm %s2043_s6, %s1152_s29  ;;  %s386_s23 = int_to_ptr.vmem [resolvable:$true] %s385_s23 }
  0x67   : > { %s1438_s0 = scalar_lea.hbm %s383_s21, 16  ;;  %s1443_s26 = scalar_lea.hbm %s2043_s6, 64 }
  0x68   : > { %p1439_p6 = scmp.ne.s32.totalorder %s383_s21, %s1438_s0  ;;  %p1444_p4 = scmp.lt.s32.totalorder %s383_s21, %s2043_s6 }
  0x69   : > { %p1445_p8 = scmp.lt.s32.totalorder %s1443_s26, %s1438_s0 }
  0x6a   : > { %p1441_p3 = pnand %p1439_p6, %p1752_p12 }
  0x6b   : > { %p1446_p9 = por %p1445_p8, %p1444_p4 }
  0x6c   : > { %p1442_p7 = pneg %p1441_p3 }
  0x6e   : > { %p1447_p10 = pnand %p1446_p9, %p1442_p7 }
  0x70   : > { %1450 = shalt.err (!%p1447_p10)
}
  0x71   : > { %s1451_s1 = scalar_lea.vmem %s386_s23, 16  ;;  %s1578_s18 = smov [#allocation10]  }
  0x72   : > { %p1452_p11 = scmp.ne.s32.totalorder %s386_s23, %s1451_s1  ;;  %s1456_s19 = sshll.u32 %s1578_s18, 4  ;;  %s1457_s19 = int_to_ptr.vmem [resolvable:$false] %s1456_s19 }
  0x73   : > { %s1458_s29 = scalar_lea.vmem %s1457_s19, 32  ;;  %p1459_p13 = scmp.lt.s32.totalorder %s386_s23, %s1457_s19 }
  0x74   : > { %p1454_p5 = pnand %p1452_p11, %p1752_p12  ;;  %p1460_p2 = scmp.lt.s32.totalorder %s1458_s29, %s1451_s1 }
  0x76   : > { %p1455_p1 = pneg %p1454_p5  ;;  %p1461_p0 = por %p1460_p2, %p1459_p13 }
  0x78   : > { %p1462_p6 = pnand %p1461_p0, %p1455_p1 }
  0x7a   : > { %1465 = shalt.err (!%p1462_p6)
}
  0x7b   : > { %p2095_p3 = scmp.ne.s32.totalorder %s2087_s25, 0  ;;  %s1153_s0 = sshll.u32 %s1727_s22, 3 }
  0x7c   : > { %s1154_s5 = sshll.u32 %s1570_s16, 7  ;;  %s396_s9 = scalar_lea.vmem [#allocation11], %s1153_s0 }
  0x7d   : > { %1246 = dma.hbm_to_vmem [thread:$0]  (!%p2095_p3), %s383_s21, 16, %s386_s23, %s1746_s28  }
  0x7e   : > { %s1820_s11 = scalar_lea.hbm %s2044_s7, %s1154_s5  ;;  %s403_s30 = sshll.u32 %s396_s9, 4  ;;  %s404_s30 = int_to_ptr.vmem [resolvable:$true] %s403_s30 }
  0x7f   : > { %s393_s26 = scalar_lea.sflag [#allocation12], %s1727_s22  ;;  %s1466_s12 = scalar_lea.hbm %s1820_s11, 128 }
  0x80   : > { %p1467_p7 = scmp.ne.s32.totalorder %s1820_s11, %s1466_s12  ;;  %s1471_s21 = scalar_lea.hbm %s2044_s7, 512 }
  0x81   : > { %p1472_p9 = scmp.lt.s32.totalorder %s1820_s11, %s2044_s7  ;;  %p1473_p10 = scmp.lt.s32.totalorder %s1471_s21, %s1466_s12 }
  0x82   : > { %p1469_p4 = pnand %p1467_p7, %p1752_p12 }
  0x83   : > { %p1474_p11 = por %p1473_p10, %p1472_p9 }
  0x84   : > { %p1470_p8 = pneg %p1469_p4 }
  0x86   : > { %p1475_p5 = pnand %p1474_p11, %p1470_p8 }
  0x88   : > { %1478 = shalt.err (!%p1475_p5)
}
  0x89   : > { %s1479_s19 = scalar_lea.vmem %s404_s30, 128  ;;  %s1579_s22 = smov [#allocation11]  }
  0x8a   : > { %p1480_p1 = scmp.ne.s32.totalorder %s404_s30, %s1479_s19  ;;  %s1484_s29 = sshll.u32 %s1579_s22, 4  ;;  %s1485_s29 = int_to_ptr.vmem [resolvable:$false] %s1484_s29 }
  0x8b   : > { %s1486_s0 = scalar_lea.vmem %s1485_s29, 256  ;;  %p1487_p0 = scmp.lt.s32.totalorder %s404_s30, %s1485_s29 }
  0x8c   : > { %p1482_p13 = pnand %p1480_p1, %p1752_p12  ;;  %p1488_p6 = scmp.lt.s32.totalorder %s1486_s0, %s1479_s19 }
  0x8e   : > { %p1483_p2 = pneg %p1482_p13  ;;  %p1489_p7 = por %p1488_p6, %p1487_p0 }
  0x90   : > { %p1490_p4 = pnand %p1489_p7, %p1483_p2 }
  0x92   : > { %1493 = shalt.err (!%p1490_p4)
}
  0x93   : > { %1249 = dma.hbm_to_vmem [thread:$0]  (!%p2095_p3), %s1820_s11, 128, %s404_s30, %s393_s26  }
  0x94   : > { %p2096_p8 = scmp.ne.s32.totalorder %s2083_s27, 0 }
  0x95   : > { %p2097_p9 = scmp.eq.s32.totalorder (!%p2096_p8), %s1660_s17, 0 }
  0x96   : > { %419 = sbr.rel (%p2096_p8) target bundleno = 621 (0x26d), region = 56 }
  0x9b   : > { %1537 = dma.done.wait (%p2097_p9), [#allocation3], 128   ;;  %p2098_p12 = pmov %p2097_p9 }
  0x9c   : > { %p2099_p10 = pmov %p2097_p9 }
  0x9d   : > { %1539 = vsyncadd (%p2098_p12), [#allocation3], 4294967168 }
  0x9e   : > { %1541 = dma.done.wait (%p2099_p10), [#allocation6], 768   ;;  %p2100_p11 = pmov %p2097_p9 }
  0x9f   : > { %s433_s25 = sand.u32 1, %s1660_s17   ;;  %s1851_s13 = sand.u32 1, %s1562_s14  }
  0xa0   : > { %1543 = vsyncadd (%p2100_p11), [#allocation6], 4294966528  ;;  %s1159_s27 = sshll.u32 %s1851_s13, 4  ;;  %s434_s5 = scalar_lea.sflag [#allocation9], %s433_s25 }
  0xa1   : > { %s1854_s15 = scalar_lea.vmem [#allocation8], %s1159_s27  ;;  %p2101_p3 = scmp.ne.s32.totalorder %s2078_s24, 0 }
  0xa3   : > { %1545 = dma.done.wait (%p2101_p3), %s434_s5, 272  }
  0xa4   : > { %1547 = vsyncadd (%p2101_p3), %s434_s5, 4294967024  ;;  %s1160_s20 = sshll.u32 %s1851_s13, 3  ;;  %s445_s11 = scalar_lea.vmem [#allocation10], %s1851_s13 }
  0xa5   : > { %s451_s9 = scalar_lea.sflag [#allocation12], %s1851_s13  ;;  %s1865_s30 = scalar_lea.vmem [#allocation11], %s1160_s20 }
  0xa6   : > { %1549 = dma.done.wait (%p2101_p3), %s451_s9, 128  }
  0xa7   : > { %1551 = vsyncadd (%p2101_p3), %s451_s9, 4294967168  ;;  %v1580_v0 = vmov 0.0   ;;  %vm1581_vm0 = vmmov 0   ;;  %v1877_v1 = vld [vmem:[#allocation5 + $0x18] sm:$0xff]  ;;  %v1880_v3 = vld [vmem:[#allocation5 + $0x10] sm:$0xff]  ;;  %p507_p5 = scmp.lt.s32.totalorder %s1660_s17, 3 }
  0xa8   : > { %1187 = vmatprep.subr.mxu0 %v1580_v0  ;;  %1191 = vmatprep.mubr.msk.f32.mxu0 %vm1581_vm0, %v1580_v0  ;;  %v523_v2 = vmin.f32 %v1877_v1, 20.0  ;;  %v522_v4 = vmin.f32 %v1880_v3, 20.0  ;;  %v1883_v5 = vld [vmem:[#allocation7 + $0x8] sm:$0xff]  ;;  %v1889_v9 = vld [vmem:[%s2039_s2 + $0x1] sm:$0x1]  ;;  %vm521_vm1 = vcmp.gt.f32.partialorder %v1877_v1, 20.0 }
  0xa9   : > { %1194 = vmatprep.subr.mxu1 %v1580_v0  ;;  %1196 = vmatprep.mubr.msk.f32.mxu1 %vm1581_vm0, %v1580_v0  ;;  %v605_v7 = vmin.f32 %v1883_v5, 20.0  ;;  %v576_v11 = vmin.f32 %v1889_v9, 20.0  ;;  %v1895_v12 = vld [vmem:[%s2041_s4 + $0x2] sm:$0x3]  ;;  %s1909_s23 = scalar_select %p507_p5, %s1660_s17, 3  ;;  %vm520_vm3 = vcmp.gt.f32.partialorder %v1880_v3, 20.0 }
  0xaa   : > { %v526_v6 = vmul.f32 1.442695, %v523_v2  ;;  %v524_v8 = vmul.f32 1.442695, %v522_v4  ;;  %v634_v14 = vmin.f32 %v1895_v12, 20.0  ;;  %vm665_vm5 = vcmask 130048  }
  0xab   : > { %v606_v10 = vmul.f32 1.442695, %v605_v7  ;;  %v577_v13 = vmul.f32 1.442695, %v576_v11  ;;  %v549_v46 = vld [vmem:[%s1854_s15 + $0x8] sm:$0xff]  ;;  %vm604_vm6 = vcmp.gt.f32.partialorder %v1883_v5, 20.0  ;;  %s513_s26 = scalar_lea.vmem %s2047_s10, %s1909_s23 }
  0xac   : > { %1302 = vpow2.f32 %v526_v6  ;;  %v635_v15 = vmul.f32 1.442695, %v634_v14  ;;  %v548_v51 = vld [vmem:[%s1854_s15] sm:$0xff]  ;;  %v516_v56 = vld [vmem:[#allocation5 + $0x8] sm:$0xff]  ;;  %vm575_vm8 = vcmp.gt.f32.partialorder %v1889_v9, 20.0  ;;  %s1162_s21 = sshll.u32 %s1909_s23, 1 }
  0xad   : > { %1304 = vpow2.f32 %v524_v8  ;;  %v515_v61 = vld [vmem:[#allocation5] sm:$0xff]  ;;  %s510_s19 = scalar_lea.vmem %s2045_s8, %s1162_s21  ;;  %vm633_vm11 = vcmp.gt.f32.partialorder %v1895_v12, 20.0  ;;  %s1582_s22 = smov 96   ;;  %vm817_vm12 = vcmask 261120   ;;  %vm893_vm13 = vcmask 58368  }
  0xae   : > { %1306 = vpow2.f32 %v606_v10  ;;  %v618_v63 = vld [vmem:[%s1865_s30] sm:$0xff]  ;;  %vm925_vm14 = vcmask 392192   ;;  %vm914_vm15 = vcmask 253952   ;;  %s2112_s28 = sld [smem:[#allocation23_spill]]  ;;  %s1176_s21 = sshll.u32 %s1660_s17, 7 }
  0xaf   : > { %1308 = vpow2.f32 %v577_v13  ;;  %v601_v10 = vld [vmem:[#allocation7] sm:$0xff]  ;;  %s501_s23 = scalar_lea.vmem [#allocation13], %s1160_s20  ;;  %s952_s0 = scalar_lea.sflag [#allocation4], %s1851_s13 }
  0xb0   : > { %1310 = vpow2.f32 %v635_v15  ;;  %s968_s1 = sshll.u32 %s501_s23, 4  ;;  %s1583_s17 = smov [#allocation13]   ;;  %s969_s1 = int_to_ptr.vmem [resolvable:$true] %s968_s1 }
  0xb1   : > { %s1494_s25 = scalar_lea.vmem %s969_s1, 128  ;;  %s1498_s27 = sshll.u32 %s1583_s17, 4  ;;  %s1499_s27 = int_to_ptr.vmem [resolvable:$false] %s1498_s27 }
  0xb2   : > { %p1495_p1 = scmp.ne.s32.totalorder %s969_s1, %s1494_s25  ;;  %s1500_s20 = scalar_lea.vmem %s1499_s27, 256 }
  0xb3   : > { %p1501_p6 = scmp.lt.s32.totalorder %s969_s1, %s1499_s27  ;;  %p1502_p7 = scmp.lt.s32.totalorder %s1500_s20, %s1494_s25 }
  0xb4   : > { %p2114_p13 = scmp.ne.s32.totalorder %s2112_s28, 0 }
  0xb5   : > { %p1503_p4 = por %p1502_p7, %p1501_p6 }
  0xb6   : > { %p1496_p2 = pnand %p1495_p1, %p2114_p13 }
  0xb8   : > { %p1497_p0 = pneg %p1496_p2 }
  0xb9   : > { %v1303_v16 = vpop.eup %1302 }
  0xba   : > { %v1305_v17 = vpop.eup %1304  ;;  %v537_v18 = vadd.f32 1.0, %v1303_v16  ;;  %v540_v25 = vmul.f32 -0.5, %v1303_v16  ;;  %v543_v30 = vand.u32 2147483647, %v1303_v16  ;;  %p1504_p8 = pnand %p1503_p4, %p1497_p0 }
  0xbb   : > { %v1307_v19 = vpop.eup %1306  ;;  %v528_v20 = vadd.f32 1.0, %v1305_v17  ;;  %v531_v27 = vmul.f32 -0.5, %v1305_v17  ;;  %v534_v32 = vand.u32 2147483647, %v1305_v17 }
  0xbc   : > { %1312 = vlog2.f32 %v537_v18  ;;  %v608_v21 = vadd.f32 1.0, %v1307_v19  ;;  %v1309_v22 = vpop.eup %1308  ;;  %v611_v28 = vmul.f32 -0.5, %v1307_v19  ;;  %v541_v29 = vadd.f32 1.0, %v540_v25 }
  0xbd   : > { %1314 = vlog2.f32 %v528_v20  ;;  %v579_v23 = vadd.f32 1.0, %v1309_v22  ;;  %v1898_v24 = vpop.eup %1310  ;;  %v532_v31 = vadd.f32 1.0, %v531_v27  ;;  %v582_v33 = vmul.f32 -0.5, %v1309_v22 }
  0xbe   : > { %1316 = vlog2.f32 %v608_v21  ;;  %v637_v26 = vadd.f32 1.0, %v1898_v24  ;;  %v612_v34 = vadd.f32 1.0, %v611_v28  ;;  %v542_v35 = vmul.f32 %v1303_v16, %v541_v29 }
  0xbf   : > { %1318 = vlog2.f32 %v579_v23  ;;  %v614_v36 = vand.u32 2147483647, %v1307_v19  ;;  %v640_v37 = vmul.f32 -0.5, %v1898_v24  ;;  %vm1904_vm2 = vcmp.lt.f32.partialorder %v543_v30, 0.0004427343 }
  0xc0   : > { %1320 = vlog2.f32 %v637_v26  ;;  %v533_v40 = vmul.f32 %v1305_v17, %v532_v31  ;;  %vm1912_vm4 = vcmp.lt.f32.partialorder %v534_v32, 0.0004427343  ;;  %v583_v44 = vadd.f32 1.0, %v582_v33  ;;  %v1954_v17 = vld [vmem:[#allocation2] sm:$0xff] }
  0xc1   : > { %v613_v48 = vmul.f32 %v1307_v19, %v612_v34  ;;  %v585_v49 = vand.u32 2147483647, %v1309_v22  ;;  %vm1921_vm7 = vcmp.lt.f32.partialorder %v614_v36, 0.0004427343  ;;  %v641_v54 = vadd.f32 1.0, %v640_v37 }
  0xc2   : > { %v643_v59 = vand.u32 2147483647, %v1898_v24  ;;  %v584_v2 = vmul.f32 %v1309_v22, %v583_v44  ;;  %v589_v19 = vld [vmem:[%s445_s11] sm:$0x1]  ;;  %v563_v20 = vmul.f32 %v516_v56, %v516_v56  ;;  %v562_v25 = vmul.f32 %v515_v61, %v515_v61 }
  0xc3   : > { %vm1939_vm9 = vcmp.lt.f32.partialorder %v585_v49, 0.0004427343  ;;  %v642_v13 = vmul.f32 %v1898_v24, %v641_v54  ;;  %v647_v23 = vld [vmem:[%s510_s19] sm:$0x3]  ;;  %v625_v31 = vmul.f32 %v601_v10, %v601_v10 }
  0xc4   : > { %vm1950_vm10 = vcmp.lt.f32.partialorder %v643_v59, 0.0004427343  ;;  %v630_v33 = vld [vmem:[%s2041_s4] sm:$0x3] }
  0xc5   : > { %v654_v43 = vmul.f32 %v630_v33, %v630_v33 }
  0xc9   : > { %v1313_v38 = vpop.eup %1312 }
  0xca   : > { %v1315_v41 = vpop.eup %1314  ;;  %v539_v42 = vmul.f32 0.6931472, %v1313_v38 }
  0xcb   : > { %v1317_v45 = vpop.eup %1316  ;;  %v530_v47 = vmul.f32 0.6931472, %v1315_v41 }
  0xcc   : > { %v545_v50 = vsel %vm1904_vm2, %v542_v35, %v539_v42  ;;  %v610_v52 = vmul.f32 0.6931472, %v1317_v45  ;;  %v1319_v55 = vpop.eup %1318  ;;  %vm902_vm2 = vcmask 64512  }
  0xcd   : > { %v547_v57 = vsel %vm521_vm1, %v1877_v1, %v545_v50  ;;  %v536_v58 = vsel %vm1912_vm4, %v533_v40, %v530_v47  ;;  %v1321_v4 = vpop.eup %1320  ;;  %vm949_vm1 = vcmask 0  }
  0xce   : > { %v551_v60 = vmul.f32 %v549_v46, %v547_v57  ;;  %1322 = vlog2.f32 %v547_v57  ;;  %v546_v62 = vsel %vm520_vm3, %v1880_v3, %v536_v58  ;;  %v616_v1 = vsel %vm1921_vm7, %v613_v48, %v610_v52 }
  0xcf   : > { %v550_v6 = vmul.f32 %v548_v51, %v546_v62  ;;  %1324 = vlog2.f32 %v546_v62  ;;  %v617_v11 = vsel %vm604_vm6, %v1883_v5, %v616_v1  ;;  %v581_v3 = vmul.f32 0.6931472, %v1319_v55 }
  0xd0   : > { %v553_v8 = vadd.f32 %v551_v60, %v516_v56  ;;  %v619_v15 = vmul.f32 %v618_v63, %v617_v11  ;;  %1326 = vlog2.f32 %v617_v11  ;;  %v639_v18 = vmul.f32 0.6931472, %v1321_v4 }
  0xd1   : > { %v552_v14 = vadd.f32 %v550_v6, %v515_v61  ;;  %v587_v5 = vsel %vm1939_vm9, %v584_v2, %v581_v3  ;;  %v561_v24 = vmul.f32 %v547_v57, %v547_v57  ;;  %v560_v27 = vmul.f32 %v546_v62, %v546_v62 }
  0xd2   : > { %1188 = vmatpush3.msra.mxu0 %v553_v8  ;;  %v620_v21 = vadd.f32 %v619_v15, %v601_v10  ;;  %v588_v22 = vsel %vm575_vm8, %v1889_v9, %v587_v5  ;;  %v645_v26 = vsel %vm1950_vm10, %v642_v13, %v639_v18  ;;  %v572_v9 = vld [vmem:[%s2039_s2] sm:$0x1]  ;;  %v624_v32 = vmul.f32 %v617_v11, %v617_v11 }
  0xd3   : > { %1189 = vmatprep.subr.mxu0 %v1580_v0  ;;  %1328 = vlog2.f32 %v588_v22  ;;  %v646_v28 = vsel %vm633_vm11, %v1895_v12, %v645_v26  ;;  %v590_v29 = vmul.f32 %v589_v19, %v588_v22  ;;  %v565_v34 = vadd.f32 %v563_v20, %v561_v24 }
  0xd4   : > { %1190 = vmatpush3.msra.mxu0 %v552_v14  ;;  %743 = vrot.lane.b32.xlu0 %v620_v21, %s1582_s22  ;;  %v648_v30 = vmul.f32 %v647_v23, %v646_v28  ;;  %1330 = vlog2.f32 %v646_v28  ;;  %v564_v36 = vadd.f32 %v562_v25, %v560_v27  ;;  %v626_v39 = vadd.f32 %v625_v31, %v624_v32  ;;  %s2113_s22 = sld [smem:[#allocation28_spill]] }
  0xd5   : > { %1192 = vmatmul.mubr.msk.f32.vlgmr.msra.gmra.mxu0 %vm665_vm5, %v1954_v17  ;;  %1199 = vmatprep.subr.mxu0 %v1580_v0  ;;  %v1981_v12 = vadd.f32 %v590_v29, %v572_v9  ;;  %v567_v41 = vmul.f32 0.5, %v565_v34  ;;  %v653_v42 = vmul.f32 %v646_v28, %v646_v28  ;;  %v596_v48 = vmul.f32 %v572_v9, %v572_v9 }
  0xd6   : > { %1201 = vmatprep.mubr.msk.f32.mxu0 %vm1581_vm0, %v1580_v0  ;;  %1200 = vmatpush3.xpose.msk.msra.mxu0 %vm817_vm12, %v620_v21  ;;  %v649_v35 = vadd.f32 %v648_v30, %v630_v33  ;;  %v566_v45 = vmul.f32 0.5, %v564_v36  ;;  %v627_v51 = vmul.f32 0.5, %v626_v39  ;;  %v595_v52 = vmul.f32 %v588_v22, %v588_v22 }
  0xd7   : > { %v655_v54 = vadd.f32 %v654_v43, %v653_v42 }
  0xd8   : > { %v1985_v37 = vsel %vm893_vm13, %v649_v35, 0.0  ;;  %v597_v62 = vadd.f32 %v596_v48, %v595_v52 }
  0xd9   : > { %v656_v6 = vmul.f32 0.5, %v655_v54 }
  0xda   : > { %v598_v13 = vmul.f32 0.5, %v597_v62  ;;  %s966_s29 = scalar_lea.hbm %s2113_s22, %s1176_s21 }
  0xdb   : > { %v1323_v38 = vpop.eup %1322 }
  0xdc   : > { %v1325_v0 = vpop.eup %1324  ;;  %v557_v40 = vmul.f32 0.6931472, %v1323_v38 }
  0xdd   : > { %v555_v44 = vmul.f32 0.6931472, %v1325_v0  ;;  %v1327_v46 = vpop.eup %1326 }
  0xde   : > { %v559_v47 = vsub.f32 0.0, %v557_v40  ;;  %v622_v50 = vmul.f32 0.6931472, %v1327_v46 }
  0xdf   : > { %v558_v49 = vsub.f32 0.0, %v555_v44 }
  0xe0   : > { %v569_v53 = vadd.f32 %v567_v41, %v559_v47  ;;  %v1329_v55 = vpop.eup %1328  ;;  %v623_v57 = vsub.f32 0.0, %v622_v50  ;;  %v660_v41 = vlaneseq }
  0xe1   : > { %v568_v56 = vadd.f32 %v566_v45, %v558_v49  ;;  %v1331_v59 = vpop.eup %1330  ;;  %v593_v2 = vmul.f32 0.6931472, %v1329_v55 }
  0xe2   : > { %v1164_v58 = vadd.f32 -0.5, %v569_v53  ;;  %v628_v61 = vadd.f32 %v627_v51, %v623_v57  ;;  %v651_v4 = vmul.f32 0.6931472, %v1331_v59 }
  0xe3   : > { %v1163_v60 = vadd.f32 -0.5, %v568_v56  ;;  %v594_v3 = vsub.f32 0.0, %v593_v2 }
  0xe4   : > { %v905_v63 = vsel %vm817_vm12, %v1164_v58, 0.0  ;;  %v1167_v1 = vadd.f32 -0.5, %v628_v61  ;;  %v652_v10 = vsub.f32 0.0, %v651_v4  ;;  %v895_v58 = vrot.slane %v1985_v37, 4 }
  0xe5   : > { %v904_v7 = vsel %vm817_vm12, %v1163_v60, 0.0  ;;  %v599_v18 = vadd.f32 %v598_v13, %v594_v3 }
  0xe6   : > { %v906_v8 = vadd.f32 %v905_v63, %v904_v7  ;;  %v926_v11 = vsel %vm925_vm14, %v1167_v1, 0.0  ;;  %v657_v15 = vadd.f32 %v656_v6, %v652_v10  ;;  %v896_v59 = vadd.f32 %v895_v58, %v1985_v37 }
  0xe7   : > { %927 = vadd.xlane.f32.xlu1 %v926_v11  ;;  %v1166_v22 = vadd.f32 -0.5, %v599_v18 }
  0xe8   : > { %v907_v14 = vrot.slane %v906_v8, 4  ;;  %v1169_v5 = vadd.f32 -0.5, %v657_v15  ;;  %v897_v60 = vrot.slane %v896_v59, 2 }
  0xea   : > { %v908_v16 = vadd.f32 %v907_v14, %v906_v8  ;;  %v937_v20 = vsel %vm893_vm13, %v1169_v5, 0.0  ;;  %v898_v61 = vadd.f32 %v897_v60, %v896_v59 }
  0xeb   : > { %938 = vadd.xlane.f32.xlu1 %v937_v20 }
  0xec   : > { %v909_v19 = vrot.slane %v908_v16, 2  ;;  %v899_v62 = vrot.slane %v898_v61, 1 }
  0xee   : > { %v910_v21 = vadd.f32 %v909_v19, %v908_v16  ;;  %v900_v63 = vadd.f32 %v899_v62, %v898_v61 }
  0xf0   : > { %v911_v23 = vrot.slane %v910_v21, 1 }
  0xf2   : > { %v912_v24 = vadd.f32 %v911_v23, %v910_v21 }
  0xf4   : > { %v913_v25 = vadd.f32 %v1166_v22, %v912_v24 }
  0xf6   : > { %v915_v26 = vsel %vm914_vm15, %v913_v25, 0.0 }
  0xf7   : > { %916 = vadd.xlane.f32.xlu0 %v915_v26 }
 0x146   : > { %v744_v27 = vpop.permute.xlu0 %743 }
 0x147   : > { %1195 = vmatpush3.xpose.msk.msra.mxu1 %vm665_vm5, %v744_v27 }
 0x14a   : > { %1197 = vmatmul.mubr.msk.f32.vlgmr.msra.gmra.mxu1 %vm665_vm5, %v1954_v17  ;;  %v661_v17 = vshrl.u32 %v660_v41, 7 }
 0x14c   : > { %v662_v49 = vsub.s32 0, %v661_v17 }
 0x14e   : > { %v663_v50 = vrot.slane %v1981_v12, %v662_v49 }
 0x170   : > { %v928_v28 = vpop.xlane.xlu1 %927 }
 0x171   : > { %v929_v29 = vrot.slane %v928_v28, 4 }
 0x173   : > { %v930_v31 = vadd.f32 %v929_v29, %v928_v28 }
 0x174   : > { %v939_v9 = vpop.xlane.xlu1 %938 }
 0x175   : > { %v940_v30 = vrot.slane %v939_v9, 4  ;;  %v931_v33 = vrot.slane %v930_v31, 2 }
 0x177   : > { %v941_v32 = vadd.f32 %v940_v30, %v939_v9  ;;  %v932_v38 = vadd.f32 %v931_v33, %v930_v31 }
 0x179   : > { %v942_v34 = vrot.slane %v941_v32, 2  ;;  %v933_v42 = vrot.slane %v932_v38, 1 }
 0x17b   : > { %v943_v0 = vadd.f32 %v942_v34, %v941_v32  ;;  %v934_v46 = vadd.f32 %v933_v42, %v932_v38 }
 0x17d   : > { %v944_v44 = vrot.slane %v943_v0, 1 }
 0x17f   : > { %v945_v48 = vadd.f32 %v944_v44, %v943_v0 }
 0x180   : > { %v917_v35 = vpop.xlane.xlu0 %916 }
 0x181   : > { %v918_v36 = vrot.slane %v917_v35, 4 }
 0x183   : > { %v919_v39 = vadd.f32 %v918_v36, %v917_v35 }
 0x185   : > { %v920_v40 = vrot.slane %v919_v39, 2 }
 0x187   : > { %v921_v43 = vadd.f32 %v920_v40, %v919_v39 }
 0x189   : > { %v922_v45 = vrot.slane %v921_v43, 1 }
 0x18b   : > { %v923_v47 = vadd.f32 %v922_v45, %v921_v43 }
 0x18d   : > { %1204 = vpush %v923_v47 }
 0x18e   : > { %1206 = vpush %v934_v46 }
 0x18f   : > { %1208 = vpush %v945_v48 }
 0x195   : > { %v735_v51 = vpop.f32.mrf.mxu0 }
 0x196   : > { %v736_v52 = vadd.f32 %v735_v51, %v663_v50 }
 0x197   : > { %v1193_v53 = vpop.f32.mrf.mxu0 }
 0x198   : > { %vm739_vm0 = vcmp.gt.f32.partialorder %v736_v52, 0.0  ;;  %v740_v54 = vmul.f32 0.1, %v736_v52 }
 0x19a   : > { %v741_v55 = vsel %vm739_vm0, %v736_v52, %v740_v54 }
 0x19b   : > { %1202 = vmatmul.mubr.msk.f32.vlgmr.msra.gmra.mxu0 %vm817_vm12, %v741_v55 }
 0x1be   : > { %s1205_s5 = spop %1204 }
 0x1bf   : > { %s1207_s15 = spop %1206 }
 0x1c0   : > { %s936_s11 = sadd.f32 %s1207_s15, %s1205_s5  ;;  %s1209_s9 = spop %1208 }
 0x1c2   : > { %s947_s12 = sadd.f32 %s1209_s9, %s936_s11 }
 0x1c4   : > { %v948_v12 = vstv %s947_s12 }
 0x1c5   : > { %950 = vst.msk [vmem:[%s513_s26] sm:$0x1] %vm949_vm1, %v948_v12 }
 0x20a   : > { %v813_v56 = vpop.f32.mrf.mxu1 }
 0x20c   : > { %v1198_v57 = vpop.f32.mrf.mxu1 }
 0x25b   : > { %v889_v2 = vpop.f32.mrf.mxu0 }
 0x25c   : > { %v890_v4 = vadd.f32 %v889_v2, %v813_v56 }
 0x25d   : > { %v1203_v6 = vpop.f32.mrf.mxu0 }
 0x25e   : > { %v901_v1 = vadd.f32 %v900_v63, %v890_v4 }
 0x260   : > { %903 = vst.msk [vmem:[%s501_s23] sm:$0xff] %vm902_vm2, %v901_v1 }
 0x261   : > { %1507 = shalt.err (!%p1504_p8)
}
 0x262   : > { %s1508_s5 = scalar_lea.hbm %s966_s29, 128  ;;  %s1512_s11 = scalar_lea.hbm %s2113_s22, 512 }
 0x263   : > { %p1509_p9 = scmp.ne.s32.totalorder %s966_s29, %s1508_s5  ;;  %p1513_p11 = scmp.lt.s32.totalorder %s966_s29, %s2113_s22 }
 0x264   : > { %p1514_p3 = scmp.lt.s32.totalorder %s1512_s11, %s1508_s5 }
 0x265   : > { %p1510_p12 = pnand %p1509_p9, %p2114_p13 }
 0x266   : > { %p1515_p5 = por %p1514_p3, %p1513_p11 }
 0x267   : > { %p1511_p10 = pneg %p1510_p12 }
 0x269   : > { %p1516_p1 = pnand %p1515_p5, %p1511_p10 }
 0x26b   : > { %1519 = shalt.err (!%p1516_p1)
}
 0x26c   : > { %1228 = dma.vmem_to_hbm [thread:$0]  (%p2114_p13), %s969_s1, 128, %s966_s29, %s952_s0  }
 0x26d PF: > { %s2115_s24 = sld [smem:[#allocation19_spill]]  ;;  %p1261_p2 = scmp.ge.s32.totalorder %s1570_s16, 2 }
 0x26e   : > { %s2116_s26 = sld [smem:[#allocation24_spill]] }
 0x273   : > { %s983_s12 = sand.u32 1, %s2115_s24  }
 0x274   : > { %p2117_p0 = scmp.ne.s32.totalorder %s2116_s26, 0  ;;  %s984_s21 = scalar_lea.sflag [#allocation4], %s983_s12 }
 0x276   : > { %p1251_p6 = pnand %p1261_p2, %p2117_p0 }
 0x278   : > { %p1252_p7 = pneg %p1251_p6 }
 0x27a   : > { %1553 = dma.done.wait (%p1252_p7), %s984_s21, 128  }
 0x27b   : > { %1555 = vsyncadd (%p1252_p7), %s984_s21, 4294967168  ;;  %s2118_s16 = sld [smem:[#allocation21_spill]]  ;;  %s2121_s13 = smov %s1562_s14 }
 0x27c   : > { %s2119_s23 = sld [smem:[#allocation20_spill]] }
 0x27d   : > { %s2120_s15 = sld [smem:[#allocation22_spill]] }
 0x281   : > { %p29_p4 = scmp.ge.s32.totalorder %s2118_s16, 6  }
 0x282   : > { %s2122_s14 = smov %s2119_s23 }
 0x283   :  { %31 = sbr.rel (!%p29_p4) target bundleno = 14 (0xe), region = 157 }
 0x288   :  { %995 = vsyncpa [#allocation3], 1 }
 0x289   :  { %997 = vsyncpa [#allocation3 + $0x1], 1 }
 0x28a   :  { %998 = vsyncpa [#allocation6], 1 }
 0x28b   :  { %999 = vsyncpa [#allocation9], 1 }
 0x28c   :  { %1001 = vsyncpa [#allocation9 + $0x1], 1 }
 0x28d   :  { %1002 = vsyncpa [#allocation12], 1 }
 0x28e   :  { %1004 = vsyncpa [#allocation12 + $0x1], 1 }
 0x28f   :  { %1005 = vsyncpa [#allocation4], 1 }
 0x290   :  { %1007 = vsyncpa [#allocation4 + $0x1], 1 }

</bundles_post_ra>
